<compile_context>
chip_gen: v7x
topology: tpu7x:2x2x1
jax: 0.10.0
libtpu: 0.0.40
codegen_flags: <defaults>
</compile_context>

<pallas_src>
import functools

import jax
import jax.numpy as jnp
from jax import lax
from jax.experimental import pallas as pl
from jax.experimental.pallas import tpu as pltpu


def _max_identity(dtype):
    """Neutral element for a running max in `dtype`."""
    dtype = jnp.dtype(dtype)
    if jnp.issubdtype(dtype, jnp.floating):
        return dtype.type(-jnp.inf)
    if jnp.issubdtype(dtype, jnp.integer):
        return dtype.type(jnp.iinfo(dtype).min)
    if dtype == jnp.bool_:
        return False
    raise ValueError(f"unsupported dtype for max readout: {dtype}")


def _max_readout_kernel(x_ref, o_ref, *, n_total, tn, mask_tail):
    # x_ref: (TB, TN, TD) input tile; o_ref: (TB, TD) running-max accumulator,
    # resident in VMEM across the reduction (last, "arbitrary") grid axis.
    n = pl.program_id(2)

    @pl.when(n == 0)
    def _init():
        o_ref[...] = jnp.full_like(o_ref, _max_identity(o_ref.dtype))

    x = x_ref[...]
    if mask_tail:
        # Last N tile may extend past the array; replace the stale rows with
        # the max-identity so they never win the reduction.
        limit = n_total - n * tn
        row = lax.broadcasted_iota(jnp.int32, x.shape[1:], 0)
        x = jnp.where((row < limit)[None, :, :], x, _max_identity(x.dtype))

    o_ref[...] = jnp.maximum(o_ref[...], jnp.max(x, axis=1))


def max_readout(seq: jax.Array) -> jax.Array:
    """Equivalent of torch.max(seq, 1).values for seq of shape (B, N, D)."""
    B, N, D = seq.shape
    dtype = seq.dtype
    itemsize = jnp.dtype(dtype).itemsize

    # Sublane packing factor: 8 rows/vreg for 32-bit, 16 for bf16, 32 for int8.
    sub = 8 * max(1, 4 // itemsize)

    # Batch rows per step: a full set of sublanes when possible -> dense output
    # stores; if B is smaller, use the full batch (satisfies the "equal full
    # dim" escape hatch of the (8,128) BlockSpec rule).
    TB = sub if B >= sub else B

    # Feature tiling: last block dim must be a multiple of 128 or the full D.
    TD = min(D, 512) if D % 128 == 0 else D

    # Reduction tiling: biggest TN (multiple of the sublane packing) whose
    # single input tile stays under ~4 MiB, so the double-buffered pipeline
    # fits comfortably inside every generation's scoped-VMEM default.
    tile_budget_bytes = 4 * 1024 * 1024
    tn_cap = max(sub, (tile_budget_bytes // (TB * TD * itemsize)) // sub * sub)
    if N <= sub:
        TN = N                                   # full dim, single block
    else:
        TN = min(tn_cap, (N // sub) * sub)       # multiple of sub, never > N

    mask_tail = (N % TN) != 0

    grid = (pl.cdiv(B, TB), pl.cdiv(D, TD), pl.cdiv(N, TN))

    kernel = functools.partial(
        _max_readout_kernel, n_total=N, tn=TN, mask_tail=mask_tail
    )

    return pl.pallas_call(
        kernel,
        out_shape=jax.ShapeDtypeStruct((B, D), dtype),
        grid_spec=pltpu.PrefetchScalarGridSpec(
            num_scalar_prefetch=0,
            grid=grid,
            in_specs=[
                # input array (B, N, D): block index = (batch, n, d)
                pl.BlockSpec((TB, TN, TD), lambda b, d, n: (b, n, d)),
            ],
            # output block index independent of n -> resident accumulator
            out_specs=pl.BlockSpec((TB, TD), lambda b, d, n: (b, d)),
        ),
        compiler_params=pltpu.CompilerParams(
            dimension_semantics=("parallel", "parallel", "arbitrary"),
        ),
    )(seq)


if __name__ == "__main__":
    key = jax.random.PRNGKey(0)

    # Primary test: shapes implied by the module (batch=2, seq=8, hidden=32).
    B, N, D = 2, 8, 32
    seq = jax.random.normal(key, (B, N, D), dtype=jnp.float32)
    out = jax.block_until_ready(max_readout(seq))
    ref = jnp.max(seq, axis=1)
    assert out.shape == (B, D), f"bad shape {out.shape}"
    assert jnp.allclose(out, ref), "Pallas MaxReadout mismatch vs reference"

    # Secondary test: non-divisible shapes exercising partial blocks and the
    # in-kernel tail mask on the reduction axis.
    B2, N2, D2 = 5, 37, 96
    seq2 = jax.random.normal(jax.random.PRNGKey(1), (B2, N2, D2), dtype=jnp.float32)
    out2 = jax.block_until_ready(max_readout(seq2))
    ref2 = jnp.max(seq2, axis=1)
    assert out2.shape == (B2, D2), f"bad shape {out2.shape}"
    assert jnp.allclose(out2, ref2), "Pallas MaxReadout (ragged) mismatch vs reference"

    print("KERNEL_OK")
</pallas_src>

<mosaic_0001>
module attributes {stable_mosaic.version = 11 : i64} {
  func.func @_max_readout_kernel(%arg0: i32, %arg1: i32, %arg2: i32, %arg3: memref<2x8x32xf32, #tpu.memory_space<vmem>>, %arg4: memref<2x32xf32, #tpu.memory_space<vmem>>) attributes {dimension_semantics = [#tpu.dimension_semantics<parallel>, #tpu.dimension_semantics<parallel>, #tpu.dimension_semantics<arbitrary>], iteration_bounds = array<i64: 1, 1, 1>, scalar_prefetch = 0 : i64, scratch_operands = 0 : i64, tpu.core_type = #tpu.core_type<tc>, window_params = [{transform_indices = @transform_0, window_bounds = array<i64: 2, 8, 32>}, {transform_indices = @transform_1, window_bounds = array<i64: 2, 32>}]} {
    %c0_i32 = arith.constant 0 : i32
    %0 = arith.cmpi eq, %arg2, %c0_i32 : i32
    %1 = arith.extui %0 : i1 to i32
    %c0_i32_0 = arith.constant 0 : i32
    %2 = arith.cmpi ne, %1, %c0_i32_0 : i32
    scf.if %2 {
      %cst_7 = arith.constant 0xFF800000 : f32
      %8 = vector.broadcast %cst_7 : f32 to vector<2x32xf32>
      %c0_8 = arith.constant 0 : index
      %c0_9 = arith.constant 0 : index
      %9 = vector.load %arg4[%c0_8, %c0_9] : memref<2x32xf32, #tpu.memory_space<vmem>>, vector<2x32xf32>
      tpu.vector_store %arg4[%c0_8, %c0_9], %8 {strides = array<i32>} : memref<2x32xf32, #tpu.memory_space<vmem>>, vector<2x32xf32>,
    } else {
    }
    %c0 = arith.constant 0 : index
    %c0_1 = arith.constant 0 : index
    %c0_2 = arith.constant 0 : index
    %3 = vector.load %arg3[%c0, %c0_1, %c0_2] : memref<2x8x32xf32, #tpu.memory_space<vmem>>, vector<2x8x32xf32>
    %c0_3 = arith.constant 0 : index
    %c0_4 = arith.constant 0 : index
    %4 = vector.load %arg4[%c0_3, %c0_4] : memref<2x32xf32, #tpu.memory_space<vmem>>, vector<2x32xf32>
    %cst = arith.constant dense<0xFF800000> : vector<2x32xf32>
    %5 = vector.multi_reduction <maximumf>, %3, %cst [1] : vector<2x8x32xf32> to vector<2x32xf32>
    %6 = arith.maximumf %4, %5 : vector<2x32xf32>
    %c0_5 = arith.constant 0 : index
    %c0_6 = arith.constant 0 : index
    %7 = vector.load %arg4[%c0_5, %c0_6] : memref<2x32xf32, #tpu.memory_space<vmem>>, vector<2x32xf32>
    tpu.vector_store %arg4[%c0_5, %c0_6], %6 {strides = array<i32>} : memref<2x32xf32, #tpu.memory_space<vmem>>, vector<2x32xf32>,
    return
  }
  func.func @transform_0(%arg0: i32, %arg1: i32, %arg2: i32) -> (i32, i32, i32) {
    %c0_i32 = arith.constant 0 : i32
    return %arg0, %arg2, %arg1 : i32, i32, i32
  }
  func.func @transform_1(%arg0: i32, %arg1: i32, %arg2: i32) -> (i32, i32) {
    %c0_i32 = arith.constant 0 : i32
    return %arg0, %arg1 : i32, i32
  }
}

</mosaic_0001>

<bundles_post_ra>
// kernel: tpu_custom_call.1
= control target key start
LH: loop header
LB: loop body
LE: loop exit
PB: predicated region body
PF: predicated region fallthrough
CT: control target
= control target key end

     0   :  { %6 = vsyncpa [#allocation3], 0  ;;  %s164_s0 = inlined_call_operand.hbm [shape: f32[2,8,32], index: 0, kind: input, shape index: {}]   ;;  %s165_s1 = inlined_call_operand.hbm [shape: f32[2,32], index: 1, kind: output, shape index: {}]  }
   0x1   :  { %7 = vsyncpa [#allocation4], 0  ;;  %s123_s6 = smov [#allocation2]   ;;  %s75_s10 = scalar_lea.hbm %s164_s0, 256 }
   0x2   :  { %s13_s7 = sshll.u32 %s123_s6, 4  ;;  %p76_p0 = scmp.ne.s32.totalorder %s164_s0, %s75_s10  ;;  %s14_s7 = int_to_ptr.vmem [resolvable:$true] %s13_s7 }
   0x3   :  { %p79_p1 = scmp.lt.u32.totalorder %s75_s10, %s164_s0 }
   0x5   :  { %p81_p2 = pnand %p79_p1, %p76_p0 }
   0x7   :  { %84 = shalt.err (!%p81_p2)
}
   0x8   :  { %s85_s15 = scalar_lea.vmem %s14_s7, 256  ;;  %p90_p4 = scmp.lt.s32.totalorder %s14_s7, %s14_s7 }
   0x9   :  { %p86_p3 = scmp.ne.s32.totalorder %s14_s7, %s85_s15  ;;  %p91_p5 = scmp.lt.s32.totalorder %s85_s15, %s85_s15 }
   0xb   :  { %p92_p6 = por %p91_p5, %p90_p4 }
   0xd   :  { %p93_p7 = pnand %p92_p6, %p86_p3 }
   0xf   :  { %96 = shalt.err (!%p93_p7)
}
  0x10   :  { %s124_s16 = smov 128   ;;  %s125_s17 = smov 8  }
  0x11   :  { %19 = dma.hbm_to_vmem [thread:$0]  %s164_s0, 256, %s14_s7, [#allocation3], %s124_s16, %s124_s16, %s125_s17  }
  0x12   :  { %119 = dma.done.wait [#allocation3], 256  }
  0x13   :  { %120 = vsyncadd [#allocation3], 4294967040  ;;  %vm27_vm0 = vcmask 254976   ;;  %v126_v0 = vmov -inf   ;;  %vm32_vm1 = vcmask 261120   ;;  %v29_v1 = vld [vmem:[#allocation2] sm:$0xff] }
  0x14   :  { %28 = vst.msk [vmem:[#allocation5] sm:$0x3] %vm27_vm0, %v126_v0  ;;  %v30_v2 = vld [vmem:[#allocation2 + $0x8] sm:$0xff]  ;;  %v33_v3 = vsel %vm32_vm1, %v29_v1, -inf  ;;  %vm49_vm2 = vcmask 1041409   ;;  %s127_s0 = smov [#allocation5]  }
  0x15   :  { %v40_v4 = vsel %vm32_vm1, %v30_v2, -inf  ;;  %v34_v5 = vrot.slane %v33_v3, 4  ;;  %s61_s20 = sshll.u32 %s127_s0, 4  ;;  %s62_s20 = int_to_ptr.vmem [resolvable:$true] %s61_s20 }
  0x16   :  { %v41_v6 = vrot.slane %v40_v4, 4  ;;  %s97_s21 = scalar_lea.vmem %s62_s20, 32  ;;  %p102_p9 = scmp.lt.s32.totalorder %s62_s20, %s62_s20 }
  0x17   :  { %v35_v7 = vmax.f32 %v33_v3, %v34_v5  ;;  %p98_p8 = scmp.ne.s32.totalorder %s62_s20, %s97_s21  ;;  %p103_p10 = scmp.lt.s32.totalorder %s97_s21, %s97_s21 }
  0x18   :  { %v42_v8 = vmax.f32 %v40_v4, %v41_v6 }
  0x19   :  { %v36_v9 = vrot.slane %v35_v7, 2  ;;  %p104_p11 = por %p103_p10, %p102_p9 }
  0x1a   :  { %v43_v10 = vrot.slane %v42_v8, 2 }
  0x1b   :  { %v37_v11 = vmax.f32 %v35_v7, %v36_v9  ;;  %v31_v15 = vld [vmem:[#allocation5] sm:$0x3]  ;;  %p105_p12 = pnand %p104_p11, %p98_p8 }
  0x1c   :  { %v44_v12 = vmax.f32 %v42_v8, %v43_v10 }
  0x1d   :  { %v38_v13 = vrot.slane %v37_v11, 1 }
  0x1e   :  { %v45_v14 = vrot.slane %v44_v12, 1 }
  0x1f   :  { %v39_v16 = vmax.f32 %v37_v11, %v38_v13 }
  0x20   :  { %v46_v17 = vmax.f32 %v44_v12, %v45_v14 }
  0x22   :  { %v50_v18 = vsel %vm49_vm2, %v46_v17, %v39_v16 }
  0x23   :  { %v52_v19 = vmax.f32 %v31_v15, %v50_v18 }
  0x25   :  { %54 = vst.msk [vmem:[#allocation5] sm:$0x3] %vm27_vm0, %v52_v19 }
  0x26   :  { %108 = shalt.err (!%p105_p12)
}
  0x27   :  { %s109_s24 = scalar_lea.hbm %s165_s1, 32 }
  0x28   :  { %p110_p13 = scmp.ne.s32.totalorder %s165_s1, %s109_s24  ;;  %p113_p0 = scmp.lt.u32.totalorder %s109_s24, %s165_s1 }
  0x2a   :  { %p115_p1 = pnand %p113_p0, %p110_p13 }
  0x2c   :  { %118 = shalt.err (!%p115_p1)
}
  0x2d   :  { %64 = dma.vmem_to_hbm [thread:$0]  %s62_s20, 32, %s165_s1, [#allocation4]  }
  0x2e   :  { %121 = dma.done.wait [#allocation4], 32  }
  0x2f   :  { %122 = vsyncadd [#allocation4], 4294967264 }
  0x30   :  { %68 = vsyncpa [#allocation3], 1 }
  0x31   :  { %69 = vsyncpa [#allocation4], 1 }

</bundles_post_ra>
